<compile_context>
chip_gen: v5e
topology: v5e:2x2
jax: 0.10.0
libtpu: 0.0.40
codegen_flags: <defaults>
</compile_context>

<pallas_src>
import functools

import jax
import jax.numpy as jnp
from jax.experimental import pallas as pl
from jax.experimental.pallas import tpu as pltpu


def rnn_stacked_kernel(x_ref, wcat_ref, bih_ref, labels_ref,
                       ret_ref, loss_ref, *, unroll_for, num_rnn, hidden):
    B = x_ref.shape[0]          # batch rows in this grid tile
    H = hidden
    T = unroll_for

    out = x_ref[...]                                        # (B, H)
    hs = [None] * num_rnn                                   # zeros handled at t==0

    # Hoist weight loads and (1, H) -> (B, H) bias broadcasts out of the
    # unrolled time loop (JAX does not CSE broadcast_in_dim; weights stay in
    # vregs across the whole serial matmul chain).
    w_cat = [wcat_ref[i] for i in range(num_rnn)]           # (2H, H) each
    w_ih = [w[:H, :] for w in w_cat]                        # (H, H) static slice
    biases = [jnp.broadcast_to(bih_ref[i], (B, H)) for i in range(num_rnn)]

    # Lane-dense output slabs: buffer 128//H consecutive step outputs and store
    # unmasked 128-lane-wide slabs into the flat (B, T*H) output.  The loss is
    # accumulated at the same slab granularity so label slices are lane-aligned
    # plain vector loads (no per-step XLU rotate at H-lane offsets).
    if H <= 128 and 128 % H == 0:
        slab_steps = min(128 // H, T)
    else:
        slab_steps = 1
    slab_width = slab_steps * H

    acc = jnp.zeros((B, slab_width), jnp.float32)           # VPU accumulator
    tail = jnp.float32(0.0)                                 # odd-width tail slab

    slab_buf = []
    slab_start = 0

    for t in range(T):                                      # static unroll
        for i in range(num_rnn):                            # static unroll
            if t == 0:
                # h_i == 0: only the W_ih^T half of the fused weight matters.
                pre = jnp.dot(out, w_ih[i],
                              preferred_element_type=jnp.float32) + biases[i]
            else:
                xh = jnp.concatenate([out, hs[i]], axis=-1)  # (B, 2H)
                pre = jnp.dot(xh, w_cat[i],
                              preferred_element_type=jnp.float32) + biases[i]
            h = jnp.tanh(pre)
            hs[i] = h
            out = h

        # Buffer output; flush as a lane-dense slab and accumulate the loss
        # for the whole slab at once.
        slab_buf.append(out)
        if len(slab_buf) == slab_steps or t == T - 1:
            slab = (jnp.concatenate(slab_buf, axis=-1)
                    if len(slab_buf) > 1 else slab_buf[0])
            width = slab.shape[-1]
            ret_ref[:, slab_start:slab_start + width] = slab
            d = slab - labels_ref[:, slab_start:slab_start + width]
            if width == slab_width:
                acc = acc + d * d                           # elementwise (VPU)
            else:
                tail = tail + jnp.sum(d * d)                # rare tail slab
            slab_start += width
            slab_buf = []

    # Per-tile partial sum of squared errors; wrapper normalizes and reduces
    # across batch tiles.
    loss_ref[0, 0] = jnp.sum(acc) + tail


def _pick_batch_tile(batch):
    """Batch tile for the parallel grid: multiple of 8 sublanes when possible."""
    if batch % 8 != 0:
        return batch                      # single program over the whole batch
    bt = 8
    while bt * 2 <= min(batch // 2, 128) and batch % (bt * 2) == 0:
        bt *= 2
    return bt


def rnn_cell_stacked(x, w_ih, w_hh, b_ih, labels, *, unroll_for, num_rnn):
    """x: (B,H); w_ih/w_hh: (num_rnn,H,H) in PyTorch (out,in) layout;
    b_ih: (num_rnn,H); labels: (B, unroll_for, H)."""
    B, H = x.shape
    T = unroll_for

    # Fused, pre-transposed weight: rows [W_ih^T ; W_hh^T] so that
    # [out, h] @ W_cat == out @ W_ih^T + h @ W_hh^T.
    w_cat = jnp.concatenate(
        [jnp.transpose(w_ih, (0, 2, 1)), jnp.transpose(w_hh, (0, 2, 1))],
        axis=1).astype(jnp.float32)                          # (num_rnn, 2H, H)
    bias3d = b_ih[:, None, :].astype(jnp.float32)            # (num_rnn, 1, H)
    labels_flat = labels.reshape(B, T * H).astype(jnp.float32)

    bt = _pick_batch_tile(B)
    nb = B // bt

    kernel = functools.partial(rnn_stacked_kernel,
                               unroll_for=T, num_rnn=num_rnn, hidden=H)

    ret_flat, loss_parts = pl.pallas_call(
        kernel,
        grid=(nb,),
        out_shape=(jax.ShapeDtypeStruct((B, T * H), jnp.float32),
                   jax.ShapeDtypeStruct((nb, 1), jnp.float32)),
        in_specs=[
            pl.BlockSpec((bt, H), lambda g: (g, 0)),                  # x
            pl.BlockSpec((num_rnn, 2 * H, H), lambda g: (0, 0, 0)),   # W_cat
            pl.BlockSpec((num_rnn, 1, H), lambda g: (0, 0, 0)),       # b_ih
            pl.BlockSpec((bt, T * H), lambda g: (g, 0)),              # labels
        ],
        out_specs=(
            pl.BlockSpec((bt, T * H), lambda g: (g, 0)),              # ret
            pl.BlockSpec((1, 1), lambda g: (g, 0),
                         memory_space=pltpu.MemorySpace.SMEM),        # loss part
        ),
        compiler_params=pltpu.CompilerParams(
            dimension_semantics=("parallel",)),
    )(x.astype(jnp.float32), w_cat, bias3d, labels_flat)

    loss = jnp.sum(loss_parts) / jnp.float32(B * T * H)
    return ret_flat.reshape(B, T, H), loss


def _reference(x, w_ih, w_hh, b_ih, labels, *, unroll_for, num_rnn):
    out = x
    hs = [jnp.zeros_like(x) for _ in range(num_rnn)]
    rets = []
    for _ in range(unroll_for):
        for i in range(num_rnn):
            hs[i] = jnp.tanh(out @ w_ih[i].T + b_ih[i] + hs[i] @ w_hh[i].T)
            out = hs[i]
        rets.append(out)
    ret = jnp.stack(rets, axis=1)
    loss = jnp.mean((ret - labels) ** 2)
    return ret, loss


if __name__ == "__main__":
    # Module config: input_size == hidden_size (required by the torch module
    # since hidden state is zeros_like(inputs[0]) and outputs feed back in).
    B, H, T, NUM_RNN = 2, 32, 8, 2

    key = jax.random.PRNGKey(0)
    kx, kl, kwi, kwh, kbi = jax.random.split(key, 5)
    bound = 1.0 / jnp.sqrt(jnp.float32(H))                  # PyTorch RNNCell init
    x = jax.random.normal(kx, (B, H), jnp.float32)
    labels = jax.random.normal(kl, (B, T, H), jnp.float32)
    w_ih = jax.random.uniform(kwi, (NUM_RNN, H, H), jnp.float32, -bound, bound)
    w_hh = jax.random.uniform(kwh, (NUM_RNN, H, H), jnp.float32, -bound, bound)
    b_ih = jax.random.uniform(kbi, (NUM_RNN, H), jnp.float32, -bound, bound)
    # b_hh is fixed to 0.0 in the torch module, so it is omitted.

    ret, loss = rnn_cell_stacked(x, w_ih, w_hh, b_ih, labels,
                                 unroll_for=T, num_rnn=NUM_RNN)
    jax.block_until_ready((ret, loss))

    ret_ref, loss_ref = _reference(x, w_ih, w_hh, b_ih, labels,
                                   unroll_for=T, num_rnn=NUM_RNN)
    # Tolerance accounts for TPU default matmul precision (bf16-based passes)
    # plus fused-vs-split accumulation order and tanh lowering differences;
    # any functional bug would be O(1), not O(1e-3).
    assert jnp.allclose(ret, ret_ref, atol=1e-3, rtol=1e-3), "ret mismatch"
    assert jnp.allclose(loss, loss_ref, atol=1e-3, rtol=1e-3), "loss mismatch"

    print("KERNEL_OK")
</pallas_src>

<mosaic_0001>
module attributes {stable_mosaic.version = 11 : i64} {
  func.func @rnn_stacked_kernel(%arg0: i32, %arg1: memref<2x32xf32, #tpu.memory_space<vmem>>, %arg2: memref<2x64x32xf32, #tpu.memory_space<vmem>>, %arg3: memref<2x1x32xf32, #tpu.memory_space<vmem>>, %arg4: memref<2x256xf32, #tpu.memory_space<vmem>>, %arg5: memref<2x256xf32, #tpu.memory_space<vmem>>, %arg6: memref<1x1xf32, #tpu.memory_space<smem>>) attributes {dimension_semantics = [#tpu.dimension_semantics<parallel>], iteration_bounds = array<i64: 1>, scalar_prefetch = 0 : i64, scratch_operands = 0 : i64, tpu.core_type = #tpu.core_type<tc>, window_params = [{transform_indices = @transform_0, window_bounds = array<i64: 2, 32>}, {pipeline_mode = #tpu.pipeline_mode<synchronous>, transform_indices = @transform_1, window_bounds = array<i64: 2, 64, 32>}, {pipeline_mode = #tpu.pipeline_mode<synchronous>, transform_indices = @transform_2, window_bounds = array<i64: 2, 1, 32>}, {transform_indices = @transform_3, window_bounds = array<i64: 2, 256>}, {transform_indices = @transform_4, window_bounds = array<i64: 2, 256>}, {transform_indices = @transform_5, window_bounds = array<i64: 1, 1>}]} {
    %c0 = arith.constant 0 : index
    %c0_0 = arith.constant 0 : index
    %0 = vector.load %arg1[%c0, %c0_0] : memref<2x32xf32, #tpu.memory_space<vmem>>, vector<2x32xf32>
    %c0_1 = arith.constant 0 : index
    %c0_2 = arith.constant 0 : index
    %c0_3 = arith.constant 0 : index
    %1 = vector.load %arg2[%c0_1, %c0_2, %c0_3] : memref<2x64x32xf32, #tpu.memory_space<vmem>>, vector<1x64x32xf32>
    %2 = vector.shape_cast %1 : vector<1x64x32xf32> to vector<64x32xf32>
    %c1 = arith.constant 1 : index
    %c0_4 = arith.constant 0 : index
    %c0_5 = arith.constant 0 : index
    %3 = vector.load %arg2[%c1, %c0_4, %c0_5] : memref<2x64x32xf32, #tpu.memory_space<vmem>>, vector<1x64x32xf32>
    %4 = vector.shape_cast %3 : vector<1x64x32xf32> to vector<64x32xf32>
    %5 = vector.extract_strided_slice %2 {offsets = [0, 0], sizes = [32, 32], strides = [1, 1]} : vector<64x32xf32> to vector<32x32xf32>
    %6 = vector.extract_strided_slice %4 {offsets = [0, 0], sizes = [32, 32], strides = [1, 1]} : vector<64x32xf32> to vector<32x32xf32>
    %c0_6 = arith.constant 0 : index
    %c0_7 = arith.constant 0 : index
    %c0_8 = arith.constant 0 : index
    %7 = vector.load %arg3[%c0_6, %c0_7, %c0_8] : memref<2x1x32xf32, #tpu.memory_space<vmem>>, vector<1x1x32xf32>
    %8 = vector.shape_cast %7 : vector<1x1x32xf32> to vector<1x32xf32>
    %9 = vector.shape_cast %8 : vector<1x32xf32> to vector<1x32xf32>
    %10 = vector.broadcast %9 : vector<1x32xf32> to vector<2x32xf32>
    %c1_9 = arith.constant 1 : index
    %c0_10 = arith.constant 0 : index
    %c0_11 = arith.constant 0 : index
    %11 = vector.load %arg3[%c1_9, %c0_10, %c0_11] : memref<2x1x32xf32, #tpu.memory_space<vmem>>, vector<1x1x32xf32>
    %12 = vector.shape_cast %11 : vector<1x1x32xf32> to vector<1x32xf32>
    %13 = vector.shape_cast %12 : vector<1x32xf32> to vector<1x32xf32>
    %14 = vector.broadcast %13 : vector<1x32xf32> to vector<2x32xf32>
    %cst = arith.constant 0.000000e+00 : f32
    %15 = vector.broadcast %cst : f32 to vector<2x128xf32>
    %cst_12 = arith.constant dense<0.000000e+00> : vector<2x32xf32>
    %16 = tpu.matmul %0, %5, %cst_12 {dimension_numbers = #tpu.dot_dimension_numbers<[1], [0], [0], [1], [0, 0, 1, 1], [], []>} : vector<2x32xf32>, vector<32x32xf32>, vector<2x32xf32> -> vector<2x32xf32>
    %17 = arith.addf %16, %10 : vector<2x32xf32>
    %18 = math.tanh %17 : vector<2x32xf32>
    %cst_13 = arith.constant dense<0.000000e+00> : vector<2x32xf32>
    %19 = tpu.matmul %18, %6, %cst_13 {dimension_numbers = #tpu.dot_dimension_numbers<[1], [0], [0], [1], [0, 0, 1, 1], [], []>} : vector<2x32xf32>, vector<32x32xf32>, vector<2x32xf32> -> vector<2x32xf32>
    %20 = arith.addf %19, %14 : vector<2x32xf32>
    %21 = math.tanh %20 : vector<2x32xf32>
    %22 = tpu.concatenate %21, %18 in 1 : vector<2x32xf32>, vector<2x32xf32> -> vector<2x64xf32>
    %cst_14 = arith.constant dense<0.000000e+00> : vector<2x32xf32>
    %23 = tpu.matmul %22, %2, %cst_14 {dimension_numbers = #tpu.dot_dimension_numbers<[1], [0], [0], [1], [0, 0, 1, 1], [], []>} : vector<2x64xf32>, vector<64x32xf32>, vector<2x32xf32> -> vector<2x32xf32>
    %24 = arith.addf %23, %10 : vector<2x32xf32>
    %25 = math.tanh %24 : vector<2x32xf32>
    %26 = tpu.concatenate %25, %21 in 1 : vector<2x32xf32>, vector<2x32xf32> -> vector<2x64xf32>
    %cst_15 = arith.constant dense<0.000000e+00> : vector<2x32xf32>
    %27 = tpu.matmul %26, %4, %cst_15 {dimension_numbers = #tpu.dot_dimension_numbers<[1], [0], [0], [1], [0, 0, 1, 1], [], []>} : vector<2x64xf32>, vector<64x32xf32>, vector<2x32xf32> -> vector<2x32xf32>
    %28 = arith.addf %27, %14 : vector<2x32xf32>
    %29 = math.tanh %28 : vector<2x32xf32>
    %30 = tpu.concatenate %29, %25 in 1 : vector<2x32xf32>, vector<2x32xf32> -> vector<2x64xf32>
    %cst_16 = arith.constant dense<0.000000e+00> : vector<2x32xf32>
    %31 = tpu.matmul %30, %2, %cst_16 {dimension_numbers = #tpu.dot_dimension_numbers<[1], [0], [0], [1], [0, 0, 1, 1], [], []>} : vector<2x64xf32>, vector<64x32xf32>, vector<2x32xf32> -> vector<2x32xf32>
    %32 = arith.addf %31, %10 : vector<2x32xf32>
    %33 = math.tanh %32 : vector<2x32xf32>
    %34 = tpu.concatenate %33, %29 in 1 : vector<2x32xf32>, vector<2x32xf32> -> vector<2x64xf32>
    %cst_17 = arith.constant dense<0.000000e+00> : vector<2x32xf32>
    %35 = tpu.matmul %34, %4, %cst_17 {dimension_numbers = #tpu.dot_dimension_numbers<[1], [0], [0], [1], [0, 0, 1, 1], [], []>} : vector<2x64xf32>, vector<64x32xf32>, vector<2x32xf32> -> vector<2x32xf32>
    %36 = arith.addf %35, %14 : vector<2x32xf32>
    %37 = math.tanh %36 : vector<2x32xf32>
    %38 = tpu.concatenate %37, %33 in 1 : vector<2x32xf32>, vector<2x32xf32> -> vector<2x64xf32>
    %cst_18 = arith.constant dense<0.000000e+00> : vector<2x32xf32>
    %39 = tpu.matmul %38, %2, %cst_18 {dimension_numbers = #tpu.dot_dimension_numbers<[1], [0], [0], [1], [0, 0, 1, 1], [], []>} : vector<2x64xf32>, vector<64x32xf32>, vector<2x32xf32> -> vector<2x32xf32>
    %40 = arith.addf %39, %10 : vector<2x32xf32>
    %41 = math.tanh %40 : vector<2x32xf32>
    %42 = tpu.concatenate %41, %37 in 1 : vector<2x32xf32>, vector<2x32xf32> -> vector<2x64xf32>
    %cst_19 = arith.constant dense<0.000000e+00> : vector<2x32xf32>
    %43 = tpu.matmul %42, %4, %cst_19 {dimension_numbers = #tpu.dot_dimension_numbers<[1], [0], [0], [1], [0, 0, 1, 1], [], []>} : vector<2x64xf32>, vector<64x32xf32>, vector<2x32xf32> -> vector<2x32xf32>
    %44 = arith.addf %43, %14 : vector<2x32xf32>
    %45 = math.tanh %44 : vector<2x32xf32>
    %46 = tpu.concatenate %21, %29, %37, %45 in 1 : vector<2x32xf32>, vector<2x32xf32>, vector<2x32xf32>, vector<2x32xf32> -> vector<2x128xf32>
    %c0_20 = arith.constant 0 : index
    %c0_21 = arith.constant 0 : index
    %47 = vector.load %arg5[%c0_20, %c0_21] : memref<2x256xf32, #tpu.memory_space<vmem>>, vector<2x128xf32>
    tpu.vector_store %arg5[%c0_20, %c0_21], %46 {strides = array<i32>} : memref<2x256xf32, #tpu.memory_space<vmem>>, vector<2x128xf32>,
    %c0_22 = arith.constant 0 : index
    %c0_23 = arith.constant 0 : index
    %48 = vector.load %arg4[%c0_22, %c0_23] : memref<2x256xf32, #tpu.memory_space<vmem>>, vector<2x128xf32>
    %49 = arith.subf %46, %48 : vector<2x128xf32>
    %50 = arith.mulf %49, %49 : vector<2x128xf32>
    %51 = arith.addf %15, %50 : vector<2x128xf32>
    %52 = tpu.concatenate %45, %41 in 1 : vector<2x32xf32>, vector<2x32xf32> -> vector<2x64xf32>
    %cst_24 = arith.constant dense<0.000000e+00> : vector<2x32xf32>
    %53 = tpu.matmul %52, %2, %cst_24 {dimension_numbers = #tpu.dot_dimension_numbers<[1], [0], [0], [1], [0, 0, 1, 1], [], []>} : vector<2x64xf32>, vector<64x32xf32>, vector<2x32xf32> -> vector<2x32xf32>
    %54 = arith.addf %53, %10 : vector<2x32xf32>
    %55 = math.tanh %54 : vector<2x32xf32>
    %56 = tpu.concatenate %55, %45 in 1 : vector<2x32xf32>, vector<2x32xf32> -> vector<2x64xf32>
    %cst_25 = arith.constant dense<0.000000e+00> : vector<2x32xf32>
    %57 = tpu.matmul %56, %4, %cst_25 {dimension_numbers = #tpu.dot_dimension_numbers<[1], [0], [0], [1], [0, 0, 1, 1], [], []>} : vector<2x64xf32>, vector<64x32xf32>, vector<2x32xf32> -> vector<2x32xf32>
    %58 = arith.addf %57, %14 : vector<2x32xf32>
    %59 = math.tanh %58 : vector<2x32xf32>
    %60 = tpu.concatenate %59, %55 in 1 : vector<2x32xf32>, vector<2x32xf32> -> vector<2x64xf32>
    %cst_26 = arith.constant dense<0.000000e+00> : vector<2x32xf32>
    %61 = tpu.matmul %60, %2, %cst_26 {dimension_numbers = #tpu.dot_dimension_numbers<[1], [0], [0], [1], [0, 0, 1, 1], [], []>} : vector<2x64xf32>, vector<64x32xf32>, vector<2x32xf32> -> vector<2x32xf32>
    %62 = arith.addf %61, %10 : vector<2x32xf32>
    %63 = math.tanh %62 : vector<2x32xf32>
    %64 = tpu.concatenate %63, %59 in 1 : vector<2x32xf32>, vector<2x32xf32> -> vector<2x64xf32>
    %cst_27 = arith.constant dense<0.000000e+00> : vector<2x32xf32>
    %65 = tpu.matmul %64, %4, %cst_27 {dimension_numbers = #tpu.dot_dimension_numbers<[1], [0], [0], [1], [0, 0, 1, 1], [], []>} : vector<2x64xf32>, vector<64x32xf32>, vector<2x32xf32> -> vector<2x32xf32>
    %66 = arith.addf %65, %14 : vector<2x32xf32>
    %67 = math.tanh %66 : vector<2x32xf32>
    %68 = tpu.concatenate %67, %63 in 1 : vector<2x32xf32>, vector<2x32xf32> -> vector<2x64xf32>
    %cst_28 = arith.constant dense<0.000000e+00> : vector<2x32xf32>
    %69 = tpu.matmul %68, %2, %cst_28 {dimension_numbers = #tpu.dot_dimension_numbers<[1], [0], [0], [1], [0, 0, 1, 1], [], []>} : vector<2x64xf32>, vector<64x32xf32>, vector<2x32xf32> -> vector<2x32xf32>
    %70 = arith.addf %69, %10 : vector<2x32xf32>
    %71 = math.tanh %70 : vector<2x32xf32>
    %72 = tpu.concatenate %71, %67 in 1 : vector<2x32xf32>, vector<2x32xf32> -> vector<2x64xf32>
    %cst_29 = arith.constant dense<0.000000e+00> : vector<2x32xf32>
    %73 = tpu.matmul %72, %4, %cst_29 {dimension_numbers = #tpu.dot_dimension_numbers<[1], [0], [0], [1], [0, 0, 1, 1], [], []>} : vector<2x64xf32>, vector<64x32xf32>, vector<2x32xf32> -> vector<2x32xf32>
    %74 = arith.addf %73, %14 : vector<2x32xf32>
    %75 = math.tanh %74 : vector<2x32xf32>
    %76 = tpu.concatenate %75, %71 in 1 : vector<2x32xf32>, vector<2x32xf32> -> vector<2x64xf32>
    %cst_30 = arith.constant dense<0.000000e+00> : vector<2x32xf32>
    %77 = tpu.matmul %76, %2, %cst_30 {dimension_numbers = #tpu.dot_dimension_numbers<[1], [0], [0], [1], [0, 0, 1, 1], [], []>} : vector<2x64xf32>, vector<64x32xf32>, vector<2x32xf32> -> vector<2x32xf32>
    %78 = arith.addf %77, %10 : vector<2x32xf32>
    %79 = math.tanh %78 : vector<2x32xf32>
    %80 = tpu.concatenate %79, %75 in 1 : vector<2x32xf32>, vector<2x32xf32> -> vector<2x64xf32>
    %cst_31 = arith.constant dense<0.000000e+00> : vector<2x32xf32>
    %81 = tpu.matmul %80, %4, %cst_31 {dimension_numbers = #tpu.dot_dimension_numbers<[1], [0], [0], [1], [0, 0, 1, 1], [], []>} : vector<2x64xf32>, vector<64x32xf32>, vector<2x32xf32> -> vector<2x32xf32>
    %82 = arith.addf %81, %14 : vector<2x32xf32>
    %83 = math.tanh %82 : vector<2x32xf32>
    %84 = tpu.concatenate %59, %67, %75, %83 in 1 : vector<2x32xf32>, vector<2x32xf32>, vector<2x32xf32>, vector<2x32xf32> -> vector<2x128xf32>
    %c0_32 = arith.constant 0 : index
    %c128 = arith.constant 128 : index
    %85 = vector.load %arg5[%c0_32, %c128] : memref<2x256xf32, #tpu.memory_space<vmem>>, vector<2x128xf32>
    tpu.vector_store %arg5[%c0_32, %c128], %84 {strides = array<i32>} : memref<2x256xf32, #tpu.memory_space<vmem>>, vector<2x128xf32>,
    %c0_33 = arith.constant 0 : index
    %c128_34 = arith.constant 128 : index
    %86 = vector.load %arg4[%c0_33, %c128_34] : memref<2x256xf32, #tpu.memory_space<vmem>>, vector<2x128xf32>
    %87 = arith.subf %84, %86 : vector<2x128xf32>
    %88 = arith.mulf %87, %87 : vector<2x128xf32>
    %89 = arith.addf %51, %88 : vector<2x128xf32>
    %90 = vector.shape_cast %89 : vector<2x128xf32> to vector<1x2x128xf32>
    %cst_35 = arith.constant dense<0.000000e+00> : vector<1xf32>
    %91 = vector.multi_reduction <add>, %90, %cst_35 [1, 2] : vector<1x2x128xf32> to vector<1xf32>
    %92 = vector.shape_cast %91 : vector<1xf32> to vector<1x1x1xf32>
    %93 = vector.extract %92[0, 0, 0] : f32 from vector<1x1x1xf32>
    %cst_36 = arith.constant 0.000000e+00 : f32
    %94 = arith.addf %93, %cst_36 : f32
    %c0_37 = arith.constant 0 : index
    %c0_38 = arith.constant 0 : index
    %95 = memref.load %arg6[%c0_37, %c0_38] : memref<1x1xf32, #tpu.memory_space<smem>>
    memref.store %94, %arg6[%c0_37, %c0_38] : memref<1x1xf32, #tpu.memory_space<smem>>
    return
  }
  func.func @transform_0(%arg0: i32) -> (i32, i32) {
    %c0_i32 = arith.constant 0 : i32
    %c0_i32_0 = arith.constant 0 : i32
    return %arg0, %c0_i32 : i32, i32
  }
  func.func @transform_1(%arg0: i32) -> (i32, i32, i32) {
    %c0_i32 = arith.constant 0 : i32
    %c0_i32_0 = arith.constant 0 : i32
    %c0_i32_1 = arith.constant 0 : i32
    %c0_i32_2 = arith.constant 0 : i32
    return %c0_i32, %c0_i32_0, %c0_i32_1 : i32, i32, i32
  }
  func.func @transform_2(%arg0: i32) -> (i32, i32, i32) {
    %c0_i32 = arith.constant 0 : i32
    %c0_i32_0 = arith.constant 0 : i32
    %c0_i32_1 = arith.constant 0 : i32
    %c0_i32_2 = arith.constant 0 : i32
    return %c0_i32, %c0_i32_0, %c0_i32_1 : i32, i32, i32
  }
  func.func @transform_3(%arg0: i32) -> (i32, i32) {
    %c0_i32 = arith.constant 0 : i32
    %c0_i32_0 = arith.constant 0 : i32
    return %arg0, %c0_i32 : i32, i32
  }
  func.func @transform_4(%arg0: i32) -> (i32, i32) {
    %c0_i32 = arith.constant 0 : i32
    %c0_i32_0 = arith.constant 0 : i32
    return %arg0, %c0_i32 : i32, i32
  }
  func.func @transform_5(%arg0: i32) -> (i32, i32) {
    %c0_i32 = arith.constant 0 : i32
    %c0_i32_0 = arith.constant 0 : i32
    return %arg0, %c0_i32 : i32, i32
  }
}

</mosaic_0001>

<bundles_post_ra>
// kernel: tpu_custom_call.1
= control target key start
LH: loop header
LB: loop body
LE: loop exit
PB: predicated region body
PF: predicated region fallthrough
CT: control target
= control target key end

     0   :  { %11 = vsyncpa [#allocation3], 0  ;;  %s1029_s0 = inlined_call_operand.vmem [shape: f32[2,32], index: 0, kind: input, shape index: {}]   ;;  %s1030_s1 = inlined_call_operand.vmem [shape: f32[2,64,32], index: 1, kind: input, shape index: {}]   ;;  %s1031_s2 = inlined_call_operand.vmem [shape: f32[2,1,32], index: 2, kind: input, shape index: {}]   ;;  %s1032_s3 = inlined_call_operand.vmem [shape: f32[2,256], index: 3, kind: input, shape index: {}]   ;;  %s1033_s4 = inlined_call_operand.hbm [shape: f32[2,256], index: 4, kind: output, shape index: {0}]   ;;  %s1034_s5 = inlined_call_operand.hbm [shape: f32[1,1], index: 5, kind: output, shape index: {1}]  }
   0x1   :  { %v722_v0 = vld [vmem:[%s1030_s1 + $0x18] sm:$0xff]  ;;  %v727_v1 = vld [vmem:[%s1030_s1 + $0x10] sm:$0xff]  ;;  %v733_v2 = vld [vmem:[%s1030_s1 + $0x8] sm:$0xff] }
   0x2   :  { %64 = vmatpush.msra.mxu0 %v722_v0 }
   0x3   :  { %12 = vsyncpa [#allocation4], 0  ;;  %v739_v3 = vld [vmem:[%s1030_s1] sm:$0xff]  ;;  %vm48_vm0 = vcmask 261120   ;;  %v750_v5 = vld [vmem:[%s1030_s1 + $0x58] sm:$0xff]  ;;  %s684_s12 = smov 32  }
   0x4   :  { %65 = vmatpush.msra.mxu0 %v727_v1  ;;  %v21_v4 = vld [vmem:[%s1029_s0] sm:$0x3]  ;;  %88 = vmatpush.msra.mxu1 %v750_v5  ;;  %v756_v6 = vld [vmem:[%s1030_s1 + $0x50] sm:$0xff]  ;;  %v761_v7 = vld [vmem:[%s1030_s1 + $0x48] sm:$0xff]  ;;  %vm101_vm1 = vcmask 523264   ;;  %s686_s30 = smov 96  }
   0x5   :  { %v767_v8 = vld [vmem:[%s1030_s1 + $0x40] sm:$0xff]  ;;  %v782_v13 = vld [vmem:[%s1030_s1 + $0x38] sm:$0xff]  ;;  %v787_v14 = vld [vmem:[%s1030_s1 + $0x30] sm:$0xff]  ;;  %vm280_vm2 = vcmask 785408   ;;  %vm533_vm3 = vcmask 1041408   ;;  %s687_s9 = smov [#allocation2]  }
   0x6   :  { %66 = vmatpush.msra.mxu0 %v733_v2  ;;  %89 = vmatpush.msra.mxu1 %v756_v6  ;;  %v774_v9 = vld [vmem:[%s1031_s2] ss:$0 sm:$0xff]  ;;  %v796_v15 = vld [vmem:[%s1030_s1 + $0x28] sm:$0xff]  ;;  %v834_v17 = vld [vmem:[%s1031_s2 + $0x1] ss:$0 sm:$0xff]  ;;  %s552_s10 = sshll.u32 %s687_s9, 4  ;;  %s553_s10 = int_to_ptr.vmem [resolvable:$true] %s552_s10 }
   0x7   :  { %113 = vmatpush.msra.mxu2 %v782_v13  ;;  %v803_v16 = vld [vmem:[%s1030_s1 + $0x20] sm:$0xff]  ;;  %v855_v23 = vld [vmem:[%s1030_s1 + $0x78] sm:$0xff]  ;;  %v860_v24 = vld [vmem:[%s1030_s1 + $0x70] sm:$0xff]  ;;  %s563_s15 = sshll.u32 %s1034_s5, 4  ;;  %s688_s17 = smov [#allocation5]   ;;  %s564_s15 = int_to_ptr.hbm [resolvable:$true] %s563_s15 }
   0x8   :  { %67 = vmatpush.msra.mxu0 %v739_v3  ;;  %90 = vmatpush.msra.mxu1 %v761_v7  ;;  %v869_v25 = vld [vmem:[%s1030_s1 + $0x68] sm:$0xff]  ;;  %v876_v26 = vld [vmem:[%s1030_s1 + $0x60] sm:$0xff]  ;;  %s685_s1 = smov 64  }
   0x9   :  { %587 = vmatmul.msk.f32.vlgmr.msra.gmra.mxu0 %vm48_vm0, %v21_v4  ;;  %114 = vmatpush.msra.mxu2 %v787_v14 }
   0xa   :  { %91 = vmatpush.msra.mxu1 %v767_v8  ;;  %171 = vmatpush.msrb.mxu0 %v782_v13 }
   0xb   :  { %115 = vmatpush.msra.mxu2 %v796_v15  ;;  %142 = vmatpush.msra.mxu3 %v855_v23 }
   0xc   :  { %172 = vmatpush.msrb.mxu0 %v787_v14  ;;  %200 = vmatpush.msrb.mxu1 %v855_v23 }
   0xd   :  { %116 = vmatpush.msra.mxu2 %v803_v16  ;;  %143 = vmatpush.msra.mxu3 %v860_v24 }
   0xe   :  { %173 = vmatpush.msrb.mxu0 %v796_v15  ;;  %201 = vmatpush.msrb.mxu1 %v860_v24 }
   0xf   :  { %117 = vmatpush.msra.mxu2 %v722_v0  ;;  %144 = vmatpush.msra.mxu3 %v869_v25 }
  0x10   :  { %174 = vmatpush.msrb.mxu0 %v803_v16  ;;  %202 = vmatpush.msrb.mxu1 %v869_v25 }
  0x11   :  { %118 = vmatpush.msra.mxu2 %v727_v1  ;;  %145 = vmatpush.msra.mxu3 %v876_v26 }
  0x12   :  { %175 = vmatpush.msrb.mxu0 %v722_v0  ;;  %203 = vmatpush.msrb.mxu1 %v876_v26 }
  0x13   :  { %119 = vmatpush.msra.mxu2 %v733_v2  ;;  %146 = vmatpush.msra.mxu3 %v750_v5 }
  0x14   :  { %176 = vmatpush.msrb.mxu0 %v727_v1  ;;  %204 = vmatpush.msrb.mxu1 %v750_v5 }
  0x15   :  { %120 = vmatpush.msra.mxu2 %v739_v3  ;;  %147 = vmatpush.msra.mxu3 %v756_v6 }
  0x16   :  { %177 = vmatpush.msrb.mxu0 %v733_v2  ;;  %205 = vmatpush.msrb.mxu1 %v756_v6 }
  0x17   :  { %229 = vmatpush.msrb.mxu2 %v782_v13  ;;  %148 = vmatpush.msra.mxu3 %v761_v7 }
  0x18   :  { %178 = vmatpush.msrb.mxu0 %v739_v3  ;;  %206 = vmatpush.msrb.mxu1 %v761_v7 }
  0x19   :  { %230 = vmatpush.msrb.mxu2 %v787_v14  ;;  %149 = vmatpush.msra.mxu3 %v767_v8 }
  0x1a   :  { %303 = vmatpush.msra.mxu0 %v782_v13  ;;  %207 = vmatpush.msrb.mxu1 %v767_v8 }
  0x1b   :  { %231 = vmatpush.msrb.mxu2 %v796_v15  ;;  %258 = vmatpush.msrb.mxu3 %v855_v23 }
  0x1c   :  { %304 = vmatpush.msra.mxu0 %v787_v14 }
  0x1d   :  { %232 = vmatpush.msrb.mxu2 %v803_v16  ;;  %259 = vmatpush.msrb.mxu3 %v860_v24 }
  0x1e   :  { %305 = vmatpush.msra.mxu0 %v796_v15 }
  0x1f   :  { %233 = vmatpush.msrb.mxu2 %v722_v0  ;;  %260 = vmatpush.msrb.mxu3 %v869_v25 }
  0x20   :  { %306 = vmatpush.msra.mxu0 %v803_v16 }
  0x21   :  { %234 = vmatpush.msrb.mxu2 %v727_v1  ;;  %261 = vmatpush.msrb.mxu3 %v876_v26 }
  0x22   :  { %307 = vmatpush.msra.mxu0 %v722_v0 }
  0x23   :  { %235 = vmatpush.msrb.mxu2 %v733_v2  ;;  %262 = vmatpush.msrb.mxu3 %v750_v5 }
  0x24   :  { %308 = vmatpush.msra.mxu0 %v727_v1 }
  0x25   :  { %236 = vmatpush.msrb.mxu2 %v739_v3  ;;  %263 = vmatpush.msrb.mxu3 %v756_v6 }
  0x26   :  { %309 = vmatpush.msra.mxu0 %v733_v2 }
  0x27   :  { %264 = vmatpush.msrb.mxu3 %v761_v7 }
  0x28   :  { %310 = vmatpush.msra.mxu0 %v739_v3 }
  0x29   :  { %265 = vmatpush.msrb.mxu3 %v767_v8 }
  0x86   :  { %v69_v10 = vpop.f32.mrf.mxu0 }
  0x87   :  { %v70_v11 = vadd.f32 %v774_v9, %v69_v10 }
  0x89   :  { %612 = vtanh.f32 %v70_v11 }
  0x8f   :  { %v613_v12 = vpop.eup %612 }
  0x90   :  { %97 = vrot.lane.b32.xlu0 %v613_v12, %s684_s12  ;;  %588 = vmatmul.msk.f32.vlgmr.msra.gmra.mxu1 %vm48_vm0, %v613_v12 }
  0x91   :  { %331 = vmatpush.msra.mxu1 %v855_v23 }
  0x93   :  { %332 = vmatpush.msra.mxu1 %v860_v24 }
  0x95   :  { %333 = vmatpush.msra.mxu1 %v869_v25 }
  0x97   :  { %334 = vmatpush.msra.mxu1 %v876_v26 }
  0x99   :  { %335 = vmatpush.msra.mxu1 %v750_v5 }
  0x9b   :  { %336 = vmatpush.msra.mxu1 %v756_v6 }
  0x9d   :  { %337 = vmatpush.msra.mxu1 %v761_v7 }
  0x9f   :  { %338 = vmatpush.msra.mxu1 %v767_v8 }
 0x102   :  { %v98_v21 = vpop.permute.xlu0 %97 }
 0x10d   :  { %v93_v18 = vpop.f32.mrf.mxu1 }
 0x10e   :  { %v94_v19 = vadd.f32 %v834_v17, %v93_v18 }
 0x110   :  { %614 = vtanh.f32 %v94_v19 }
 0x116   :  { %v837_v20 = vpop.eup %614 }
 0x117   :  { %127 = vrot.lane.b32.xlu0 %v837_v20, %s684_s12  ;;  %v100_v22 = vsel %vm48_vm0, %v837_v20, %v98_v21 }
 0x118   :  { %589 = vmatmul.msk.f32.vlgmr.msra.gmra.mxu2 %vm101_vm1, %v100_v22 }
 0x119   :  { %360 = vmatpush.msra.mxu2 %v782_v13 }
 0x11b   :  { %361 = vmatpush.msra.mxu2 %v787_v14 }
 0x11d   :  { %362 = vmatpush.msra.mxu2 %v796_v15 }
 0x11f   :  { %363 = vmatpush.msra.mxu2 %v803_v16 }
 0x121   :  { %364 = vmatpush.msra.mxu2 %v722_v0 }
 0x123   :  { %365 = vmatpush.msra.mxu2 %v727_v1 }
 0x125   :  { %366 = vmatpush.msra.mxu2 %v733_v2 }
 0x127   :  { %367 = vmatpush.msra.mxu2 %v739_v3 }
 0x189   :  { %v128_v30 = vpop.permute.xlu0 %127 }
 0x19b   :  { %v122_v27 = vpop.f32.mrf.mxu2 }
 0x19c   :  { %v123_v28 = vadd.f32 %v774_v9, %v122_v27 }
 0x19e   :  { %616 = vtanh.f32 %v123_v28 }
 0x1a4   :  { %v617_v29 = vpop.eup %616 }
 0x1a5   :  { %156 = vrot.lane.b32.xlu1 %v617_v29, %s684_s12  ;;  %v130_v31 = vsel %vm48_vm0, %v617_v29, %v128_v30 }
 0x1a6   :  { %590 = vmatmul.msk.f32.vlgmr.msra.gmra.mxu3 %vm101_vm1, %v130_v31 }
 0x1a7   :  { %389 = vmatpush.msra.mxu3 %v855_v23 }
 0x1a9   :  { %390 = vmatpush.msra.mxu3 %v860_v24 }
 0x1ab   :  { %391 = vmatpush.msra.mxu3 %v869_v25 }
 0x1ad   :  { %392 = vmatpush.msra.mxu3 %v876_v26 }
 0x1af   :  { %393 = vmatpush.msra.mxu3 %v750_v5 }
 0x1b1   :  { %394 = vmatpush.msra.mxu3 %v756_v6 }
 0x1b3   :  { %395 = vmatpush.msra.mxu3 %v761_v7 }
 0x1b5   :  { %396 = vmatpush.msra.mxu3 %v767_v8 }
 0x217   :  { %v157_v35 = vpop.permute.xlu1 %156 }
 0x229   :  { %v151_v32 = vpop.f32.mrf.mxu3 }
 0x22a   :  { %v152_v33 = vadd.f32 %v834_v17, %v151_v32 }
 0x22c   :  { %618 = vtanh.f32 %v152_v33 }
 0x232   :  { %v619_v34 = vpop.eup %618 }
 0x233   :  { %185 = vrot.lane.b32.xlu1 %v619_v34, %s684_s12  ;;  %v159_v36 = vsel %vm48_vm0, %v619_v34, %v157_v35 }
 0x234   :  { %591 = vmatmul.msk.f32.vlgmr.msrb.gmra.mxu0 %vm101_vm1, %v159_v36 }
 0x235   :  { %418 = vmatpush.msrb.mxu0 %v782_v13 }
 0x237   :  { %419 = vmatpush.msrb.mxu0 %v787_v14 }
 0x239   :  { %420 = vmatpush.msrb.mxu0 %v796_v15 }
 0x23b   :  { %421 = vmatpush.msrb.mxu0 %v803_v16 }
 0x23d   :  { %422 = vmatpush.msrb.mxu0 %v722_v0 }
 0x23f   :  { %423 = vmatpush.msrb.mxu0 %v727_v1 }
 0x241   :  { %424 = vmatpush.msrb.mxu0 %v733_v2 }
 0x243   :  { %425 = vmatpush.msrb.mxu0 %v739_v3 }
 0x2a5   :  { %v929_v40 = vpop.permute.xlu1 %185 }
 0x2a6   :  { %v278_v28 = vsel %vm48_vm0, %v837_v20, %v929_v40 }
 0x2b1   :  { %v180_v37 = vpop.f32.mrf.mxu0 }
 0x2b2   :  { %v181_v38 = vadd.f32 %v774_v9, %v180_v37 }
 0x2b4   :  { %620 = vtanh.f32 %v181_v38 }
 0x2ba   :  { %v621_v39 = vpop.eup %620 }
 0x2bb   :  { %214 = vrot.lane.b32.xlu2 %v621_v39, %s684_s12  ;;  %v188_v41 = vsel %vm48_vm0, %v621_v39, %v929_v40  ;;  %v283_v39 = vld [vmem:[%s1032_s3] sm:$0x3]  ;;  %v529_v40 = vld [vmem:[%s1032_s3 + $0x2] sm:$0x3]  ;;  %s554_s3 = sshll.u32 %s1033_s4, 4  ;;  %s555_s3 = int_to_ptr.hbm [resolvable:$true] %s554_s3 }
 0x2bc   :  { %592 = vmatmul.msk.f32.vlgmr.msrb.gmra.mxu1 %vm101_vm1, %v188_v41 }
 0x2bd   :  { %447 = vmatpush.msrb.mxu1 %v855_v23 }
 0x2bf   :  { %448 = vmatpush.msrb.mxu1 %v860_v24 }
 0x2c1   :  { %449 = vmatpush.msrb.mxu1 %v869_v25 }
 0x2c3   :  { %450 = vmatpush.msrb.mxu1 %v876_v26 }
 0x2c5   :  { %451 = vmatpush.msrb.mxu1 %v750_v5 }
 0x2c7   :  { %452 = vmatpush.msrb.mxu1 %v756_v6 }
 0x2c9   :  { %453 = vmatpush.msrb.mxu1 %v761_v7 }
 0x2cb   :  { %454 = vmatpush.msrb.mxu1 %v767_v8 }
 0x315   :  { %v215_v45 = vpop.permute.xlu2 %214 }
 0x339   :  { %v209_v42 = vpop.f32.mrf.mxu1 }
 0x33a   :  { %v210_v43 = vadd.f32 %v834_v17, %v209_v42 }
 0x33c   :  { %622 = vtanh.f32 %v210_v43 }
 0x342   :  { %v944_v44 = vpop.eup %622 }
 0x343   :  { %243 = vrot.lane.b32.xlu2 %v944_v44, %s684_s12  ;;  %v217_v46 = vsel %vm48_vm0, %v944_v44, %v215_v45 }
 0x344   :  { %593 = vmatmul.msk.f32.vlgmr.msrb.gmra.mxu2 %vm101_vm1, %v217_v46 }
 0x345   :  { %476 = vmatpush.msrb.mxu2 %v782_v13 }
 0x347   :  { %477 = vmatpush.msrb.mxu2 %v787_v14 }
 0x349   :  { %478 = vmatpush.msrb.mxu2 %v796_v15 }
 0x34b   :  { %479 = vmatpush.msrb.mxu2 %v803_v16 }
 0x34d   :  { %480 = vmatpush.msrb.mxu2 %v722_v0 }
 0x34f   :  { %481 = vmatpush.msrb.mxu2 %v727_v1 }
 0x351   :  { %482 = vmatpush.msrb.mxu2 %v733_v2 }
 0x353   :  { %483 = vmatpush.msrb.mxu2 %v739_v3 }
 0x39d   :  { %v244_v50 = vpop.permute.xlu2 %243 }
 0x3c7   :  { %v238_v47 = vpop.f32.mrf.mxu2 }
 0x3c8   :  { %v239_v48 = vadd.f32 %v774_v9, %v238_v47 }
 0x3ca   :  { %624 = vtanh.f32 %v239_v48 }
 0x3d0   :  { %v625_v49 = vpop.eup %624 }
 0x3d1   :  { %288 = vrot.lane.b32.xlu0 %v625_v49, %s684_s12  ;;  %v246_v51 = vsel %vm48_vm0, %v625_v49, %v244_v50 }
 0x3d2   :  { %594 = vmatmul.msk.f32.vlgmr.msrb.gmra.mxu3 %vm101_vm1, %v246_v51 }
 0x3d3   :  { %505 = vmatpush.msrb.mxu3 %v855_v23 }
 0x3d5   :  { %506 = vmatpush.msrb.mxu3 %v860_v24 }
 0x3d7   :  { %507 = vmatpush.msrb.mxu3 %v869_v25 }
 0x3d9   :  { %508 = vmatpush.msrb.mxu3 %v876_v26 }
 0x3db   :  { %509 = vmatpush.msrb.mxu3 %v750_v5 }
 0x3dd   :  { %510 = vmatpush.msrb.mxu3 %v756_v6 }
 0x3df   :  { %511 = vmatpush.msrb.mxu3 %v761_v7 }
 0x3e1   :  { %512 = vmatpush.msrb.mxu3 %v767_v8 }
 0x443   :  { %v289_v55 = vpop.permute.xlu0 %288 }
 0x455   :  { %v267_v52 = vpop.f32.mrf.mxu3 }
 0x456   :  { %v268_v53 = vadd.f32 %v834_v17, %v267_v52 }
 0x458   :  { %626 = vtanh.f32 %v268_v53 }
 0x45e   :  { %v627_v54 = vpop.eup %626 }
 0x45f   :  { %316 = vrot.lane.b32.xlu1 %v627_v54, %s684_s12  ;;  %v291_v56 = vsel %vm48_vm0, %v627_v54, %v289_v55 }
 0x460   :  { %595 = vmatmul.msk.f32.vlgmr.msra.gmra.mxu0 %vm101_vm1, %v291_v56 }
 0x4d1   :  { %v317_v60 = vpop.permute.xlu1 %316 }
 0x4dd   :  { %v312_v57 = vpop.f32.mrf.mxu0 }
 0x4de   :  { %v313_v58 = vadd.f32 %v774_v9, %v312_v57 }
 0x4e0   :  { %628 = vtanh.f32 %v313_v58 }
 0x4e6   :  { %v629_v59 = vpop.eup %628 }
 0x4e7   :  { %345 = vrot.lane.b32.xlu2 %v629_v59, %s684_s12  ;;  %v319_v61 = vsel %vm48_vm0, %v629_v59, %v317_v60 }
 0x4e8   :  { %596 = vmatmul.msk.f32.vlgmr.msra.gmra.mxu1 %vm101_vm1, %v319_v61 }
 0x541   :  { %v346_v1 = vpop.permute.xlu2 %345 }
 0x565   :  { %v340_v62 = vpop.f32.mrf.mxu1 }
 0x566   :  { %v341_v63 = vadd.f32 %v834_v17, %v340_v62 }
 0x568   :  { %630 = vtanh.f32 %v341_v63 }
 0x56e   :  { %v980_v0 = vpop.eup %630 }
 0x56f   :  { %374 = vrot.lane.b32.xlu0 %v980_v0, %s684_s12  ;;  %v348_v2 = vsel %vm48_vm0, %v980_v0, %v346_v1 }
 0x570   :  { %597 = vmatmul.msk.f32.vlgmr.msra.gmra.mxu2 %vm101_vm1, %v348_v2 }
 0x5e1   :  { %v375_v6 = vpop.permute.xlu0 %374 }
 0x5f3   :  { %v369_v3 = vpop.f32.mrf.mxu2 }
 0x5f4   :  { %v370_v4 = vadd.f32 %v774_v9, %v369_v3 }
 0x5f6   :  { %632 = vtanh.f32 %v370_v4 }
 0x5fc   :  { %v633_v5 = vpop.eup %632 }
 0x5fd   :  { %403 = vrot.lane.b32.xlu1 %v633_v5, %s684_s12  ;;  %v377_v7 = vsel %vm48_vm0, %v633_v5, %v375_v6 }
 0x5fe   :  { %598 = vmatmul.msk.f32.vlgmr.msra.gmra.mxu3 %vm101_vm1, %v377_v7 }
 0x66f   :  { %v404_v12 = vpop.permute.xlu1 %403 }
 0x681   :  { %v398_v8 = vpop.f32.mrf.mxu3 }
 0x682   :  { %v399_v10 = vadd.f32 %v834_v17, %v398_v8 }
 0x684   :  { %634 = vtanh.f32 %v399_v10 }
 0x68a   :  { %v635_v11 = vpop.eup %634 }
 0x68b   :  { %432 = vrot.lane.b32.xlu2 %v635_v11, %s684_s12  ;;  %v406_v13 = vsel %vm48_vm0, %v635_v11, %v404_v12 }
 0x68c   :  { %599 = vmatmul.msk.f32.vlgmr.msrb.gmra.mxu0 %vm101_vm1, %v406_v13 }
 0x693   :  { %271 = vrot.lane.b32.xlu2 %v944_v44, %s685_s1 }
 0x6e5   :  { %v433_v18 = vpop.permute.xlu2 %432 }
 0x6ed   :  { %v272_v27 = vpop.permute.xlu2 %271 }
 0x6ee   :  { %v279_v29 = vsel %vm101_vm1, %v278_v28, %v272_v27 }
 0x709   :  { %v427_v14 = vpop.f32.mrf.mxu0 }
 0x70a   :  { %v428_v15 = vadd.f32 %v774_v9, %v427_v14 }
 0x70c   :  { %636 = vtanh.f32 %v428_v15 }
 0x712   :  { %v637_v16 = vpop.eup %636 }
 0x713   :  { %461 = vrot.lane.b32.xlu0 %v637_v16, %s684_s12  ;;  %v435_v19 = vsel %vm48_vm0, %v637_v16, %v433_v18 }
 0x714   :  { %600 = vmatmul.msk.f32.vlgmr.msrb.gmra.mxu1 %vm101_vm1, %v435_v19 }
 0x785   :  { %v462_v24 = vpop.permute.xlu0 %461 }
 0x791   :  { %v456_v21 = vpop.f32.mrf.mxu1 }
 0x792   :  { %v457_v22 = vadd.f32 %v834_v17, %v456_v21 }
 0x794   :  { %638 = vtanh.f32 %v457_v22 }
 0x79a   :  { %v639_v23 = vpop.eup %638 }
 0x79b   :  { %518 = vrot.lane.b32.xlu0 %v639_v23, %s685_s1  ;;  %490 = vrot.lane.b32.xlu1 %v639_v23, %s684_s12  ;;  %v464_v25 = vsel %vm48_vm0, %v639_v23, %v462_v24 }
 0x79c   :  { %601 = vmatmul.msk.f32.vlgmr.msrb.gmra.mxu2 %vm101_vm1, %v464_v25 }
 0x7a3   :  { %275 = vrot.lane.b32.xlu1 %v627_v54, %s686_s30 }
 0x80d   :  { %v491_v26 = vpop.permute.xlu1 %490  ;;  %v519_v38 = vpop.permute.xlu0 %518 }
 0x815   :  { %v276_v30 = vpop.permute.xlu1 %275 }
 0x816   :  { %v281_v31 = vsel %vm280_vm2, %v279_v29, %v276_v30 }
 0x817   :  { %282 = vst [vmem:[#allocation2] sm:$0x3] %v281_v31  ;;  %v284_v42 = vsub.f32 %v281_v31, %v283_v39 }
 0x819   :  { %v285_v45 = vmul.f32 %v284_v42, %v284_v42 }
 0x81f   :  { %v485_v32 = vpop.f32.mrf.mxu2 }
 0x820   :  { %v486_v33 = vadd.f32 %v774_v9, %v485_v32  ;;  %v525_v9 = vsel %vm48_vm0, %v980_v0, %v433_v18 }
 0x821   :  { %v526_v41 = vsel %vm101_vm1, %v525_v9, %v519_v38 }
 0x822   :  { %640 = vtanh.f32 %v486_v33 }
 0x828   :  { %v641_v34 = vpop.eup %640 }
 0x829   :  { %v493_v35 = vsel %vm48_vm0, %v641_v34, %v491_v26 }
 0x82a   :  { %602 = vmatmul.msk.f32.vlgmr.msrb.gmra.mxu3 %vm101_vm1, %v493_v35 }
 0x8ad   :  { %v514_v36 = vpop.f32.mrf.mxu3 }
 0x8ae   :  { %v515_v37 = vadd.f32 %v834_v17, %v514_v36 }
 0x8b0   :  { %642 = vtanh.f32 %v515_v37 }
 0x8b6   :  { %v643_v20 = vpop.eup %642 }
 0x8b7   :  { %522 = vrot.lane.b32.xlu2 %v643_v20, %s686_s30 }
 0x911   :  { %v523_v43 = vpop.permute.xlu2 %522 }
 0x912   :  { %v527_v17 = vsel %vm280_vm2, %v526_v41, %v523_v43 }
 0x913   :  { %528 = vst [vmem:[#allocation2 + $0x2] sm:$0x3] %v527_v17  ;;  %v530_v44 = vsub.f32 %v527_v17, %v529_v40 }
 0x914   :  { %557 = dma.vmem_to_hbm [thread:$0]  %s553_s10, 64, %s555_s3, [#allocation3]  }
 0x915   :  { %v531_v46 = vmul.f32 %v530_v44, %v530_v44 }
 0x917   :  { %v532_v47 = vadd.f32 %v531_v46, %v285_v45 }
 0x919   :  { %v534_v48 = vsel %vm533_vm3, %v532_v47, 0.0 }
 0x91a   :  { %535 = vadd.xlane.f32.xlu0 %v534_v48 }
 0x98d   :  { %v536_v49 = vpop.xlane.xlu0 %535 }
 0x98e   :  { %v537_v50 = vrot.slane %v536_v49, 4 }
 0x990   :  { %v538_v51 = vadd.f32 %v537_v50, %v536_v49 }
 0x992   :  { %v539_v52 = vrot.slane %v538_v51, 2 }
 0x994   :  { %v540_v53 = vadd.f32 %v539_v52, %v538_v51 }
 0x996   :  { %v541_v54 = vrot.slane %v540_v53, 1 }
 0x998   :  { %v542_v55 = vadd.f32 %v541_v54, %v540_v53 }
 0x99a   :  { %603 = vpush %v542_v55 }
 0x9cb   :  { %s604_s16 = spop %603 }
 0x9cc   :  { %546 = sst [smem:[#allocation5]] %s604_s16 }
 0x9cd   :  { %566 = dma.smem_to_hbm %s688_s17, 16, %s564_s15, [#allocation4]  }
 0x9ce   :  { %680 = dma.done.wait [#allocation3], 64  }
 0x9cf   :  { %681 = vsyncadd [#allocation3], 4294967232 }
 0x9d0   :  { %682 = dma.done.wait [#allocation4], 16  }
 0x9d1   :  { %683 = vsyncadd [#allocation4], 4294967280 }
 0x9d2   :  { %575 = sfence }
 0x9d3   :  { %576 = vsyncpa [#allocation3], 1 }
 0x9d4   :  { %577 = vsyncpa [#allocation4], 1 }

</bundles_post_ra>
